<compile_context>
chip_gen: v5e
topology: v5e:2x2
jax: 0.10.0
libtpu: 0.0.40
codegen_flags: <defaults>
</compile_context>

<pallas_src>
import functools

import jax
import jax.numpy as jnp
from jax import lax
from jax.experimental import pallas as pl
from jax.experimental.pallas import tpu as pltpu


def _round_up(x, m):
    return ((x + m - 1) // m) * m


def _vmem_capacity_bytes():
    """Physical per-core VMEM (128 MiB v5e/v6e, 64 MiB v7x); safe fallback."""
    try:
        info = pltpu.get_tpu_info()
        for name in ("vmem_capacity_bytes", "vmem_size_bytes", "vmem_bytes"):
            v = getattr(info, name, None)
            if v:
                return int(v)
    except Exception:
        pass
    return 64 * 1024 * 1024


def _pick_tile_s(hw, batch, n_e, e_dim, cap, requested):
    """Spatial tile: as large as ~45% of VMEM allows, 128-aligned, <= hw."""
    lane = 128
    if hw <= lane:
        return hw                          # full-dim block (no 128-divisibility needed)
    n_e_pad = _round_up(n_e, 8)
    e_dim_pad = _round_up(e_dim, 8)
    # live f32 bytes per spatial column: ~6 (n_e, t) temporaries (d, iota, where,
    # one_hot + casts) plus double-buffered z/z_q blocks and their f32 copies.
    per_col = 4 * (6 * n_e_pad + 6 * e_dim_pad + 8)
    fixed = 4 * 2 * n_e_pad * (_round_up(e_dim, lane) + lane)   # codebook + ||e||^2, x2 buffers
    budget = max(int(0.45 * cap) - fixed, lane * per_col)
    fit = max(lane, (budget // per_col) // lane * lane)
    t = 1024 if requested is None else _round_up(max(int(requested), lane), lane)
    t = min(t, fit, (hw // lane) * lane)
    if batch == 1:
        # keep >= 2 spatial tiles so the "parallel" grid can shard across the
        # two TensorCores of a v7x chip.
        t = min(t, max(lane, _round_up((hw + 1) // 2, lane)))
    return t


def _vq_kernel(z_ref, e_ref, esq_ref, zq_ref, idx_ref, loss_ref, cnt_ref, *,
               n_e, hw, tile_s, n_s_tiles, ragged, bf16_distance):
    s_tile = pl.program_id(1)

    z = z_ref[0]                                     # (e_dim, tile_s), activation dtype
    e = e_ref[...]                                   # (n_e, e_dim), codebook dtype
    z_f32 = z.astype(jnp.float32)

    # d^T = ||e||^2 + ||z||^2 - 2 E @ Z  ->  (n_e, tile_s).
    # ||e||^2 is hoisted to the wrapper.  ||z||^2 is argmin-invariant but kept so
    # the f32 rounding / tie behaviour matches the torch reference.
    cd = jnp.bfloat16 if bf16_distance else jnp.promote_types(z.dtype, e.dtype)
    ze = lax.dot_general(e.astype(cd), z.astype(cd),
                         (((1,), (0,)), ((), ())),
                         preferred_element_type=jnp.float32)          # (n_e, tile_s)
    z_sq = jnp.sum(z_f32 * z_f32, axis=0, keepdims=True)              # (1, tile_s)
    d = esq_ref[...] + z_sq - 2.0 * ze                                # (n_e, tile_s)

    # First-occurrence argmin over the codebook (sublane) axis, torch.argmin-style.
    # NOTE: an all-NaN distance column yields an all-zero one_hot (z_q column 0)
    # and an out-of-range index -- NaN inputs are assumed absent (as in rev 2).
    min_d = jnp.min(d, axis=0, keepdims=True)                         # (1, tile_s)
    iota = lax.broadcasted_iota(jnp.int32, d.shape, 0)                # (n_e, tile_s)
    idx = jnp.min(jnp.where(d == min_d, iota, n_e), axis=0, keepdims=True)
    one_hot = iota == idx                                             # (n_e, tile_s) bool

    idx_ref[0] = idx                                                  # lane-dense (1, tile_s)

    # Codebook gather on the MXU in the codebook's *native* dtype (exact: the
    # one-hot selects a single row), accumulated in f32.
    z_q = lax.dot_general(e, one_hot.astype(e.dtype),
                          (((0,), (0,)), ((), ())),
                          preferred_element_type=jnp.float32)         # (e_dim, tile_s)
    zq_ref[0] = z_q.astype(zq_ref.dtype)

    # Per-tile partial reductions (no cross-tile accumulators -> fully parallel
    # grid).  Only the last spatial tile can run past hw, so only it pays for the
    # masking; jnp.where keeps undefined out-of-bounds lanes NaN-safe.
    diff = z_q - z_f32                                                # (e_dim, tile_s)
    oh_f32 = one_hot.astype(jnp.float32)

    def write_partials(valid):
        d2, oh = diff, oh_f32
        if valid is not None:
            d2 = jnp.where(valid, d2, 0.0)
            oh = jnp.where(valid, oh, 0.0)
        loss_ref[0, 0] = jnp.sum(d2 * d2).reshape(1, 1)
        cnt_ref[0, 0] = jnp.sum(oh, axis=1, keepdims=True)            # (n_e, 1)

    if ragged:
        @pl.when(s_tile == n_s_tiles - 1)
        def _():
            col = s_tile * tile_s + lax.broadcasted_iota(jnp.int32, (1, tile_s), 1)
            write_partials(col < hw)

        @pl.when(s_tile != n_s_tiles - 1)
        def _():
            write_partials(None)
    else:
        write_partials(None)


def vector_quantizer_forward(z, embedding, beta, *, tile_s=None,
                             distance_in_bf16=False, return_min_encodings=True):
    """Forward pass of taming-transformers VectorQuantizer.

    z: (B, C=e_dim, H, W) NCHW.  embedding: (n_e, e_dim).
    Returns (z_q_nchw, loss, (perplexity, min_encodings, min_encoding_indices)),
    mirroring the PyTorch module's forward (indices are int32, shape (B*H*W, 1)).
    """
    B, C, H, W = z.shape
    n_e, e_dim = embedding.shape
    assert C == e_dim, f"channel dim {C} != e_dim {e_dim}"
    hw = H * W
    n_total = B * hw

    cap = _vmem_capacity_bytes()
    tile = _pick_tile_s(hw, B, n_e, e_dim, cap, tile_s)
    n_s_tiles = -(-hw // tile)
    ragged = (hw % tile) != 0

    # Free reshape of the NCHW tensor: spatial column s = h*W + w of batch b is
    # the e_dim-vector the torch code sees at flattened row b*H*W + s.
    z3 = z.reshape(B, e_dim, hw)
    # Hoisted ||e||^2 (computed once, f32), passed as an (n_e, 1) input.
    e_sq = jnp.sum(embedding.astype(jnp.float32) ** 2, axis=1, keepdims=True)

    kernel = functools.partial(
        _vq_kernel, n_e=n_e, hw=hw, tile_s=tile, n_s_tiles=n_s_tiles,
        ragged=ragged, bf16_distance=bool(distance_in_bf16))

    out_shapes = (
        jax.ShapeDtypeStruct((B, e_dim, hw), z.dtype),              # z_q (NCHW, flat spatial)
        jax.ShapeDtypeStruct((B, 1, hw), jnp.int32),                # indices (lane-dense)
        jax.ShapeDtypeStruct((B, n_s_tiles, 1, 1), jnp.float32),    # per-tile sq-err sums
        jax.ShapeDtypeStruct((B, n_s_tiles, n_e, 1), jnp.float32),  # per-tile code counts
    )

    zq3, idx3, loss_part, cnt_part = pl.pallas_call(
        kernel,
        out_shape=out_shapes,
        grid_spec=pltpu.PrefetchScalarGridSpec(
            num_scalar_prefetch=0,
            grid=(B, n_s_tiles),
            in_specs=[
                pl.BlockSpec((1, e_dim, tile), lambda b, s: (b, 0, s)),
                # TODO(synk): constant-index blocks are still double-buffered; a
                # single-buffer pipeline mode (or one-time manual VMEM copy) would
                # reclaim one codebook copy for very large codebooks.
                pl.BlockSpec((n_e, e_dim), lambda b, s: (0, 0)),
                pl.BlockSpec((n_e, 1), lambda b, s: (0, 0)),
            ],
            out_specs=[
                pl.BlockSpec((1, e_dim, tile), lambda b, s: (b, 0, s)),
                pl.BlockSpec((1, 1, tile), lambda b, s: (b, 0, s)),
                pl.BlockSpec((1, 1, 1, 1), lambda b, s: (b, s, 0, 0)),
                pl.BlockSpec((1, 1, n_e, 1), lambda b, s: (b, s, 0, 0)),
            ],
        ),
        compiler_params=pltpu.CompilerParams(
            dimension_semantics=("parallel", "parallel"),
            vmem_limit_bytes=max(32 * 1024 * 1024, int(0.75 * cap))),
    )(z3, embedding, e_sq)

    # Tiny final reductions (kept out of the kernel so the grid stays parallel).
    # Forward value of beta*||sg[zq]-z||^2 + ||zq-sg[z]||^2 == (1+beta)*mse.
    loss = (1.0 + float(beta)) * jnp.sum(loss_part) / jnp.float32(n_total * e_dim)
    e_mean = jnp.sum(cnt_part, axis=(0, 1, 3)) / jnp.float32(n_total)
    perplexity = jnp.exp(-jnp.sum(e_mean * jnp.log(e_mean + 1e-10)))

    min_idx = idx3.reshape(-1)[:, None]            # (B*H*W, 1), torch row order, int32
    z_q = zq3.reshape(B, e_dim, H, W)              # free: already NCHW

    min_encodings = None
    if return_min_encodings:
        # The dense (N, n_e) one-hot (torch's scatter_) is pure HBM writeback;
        # it is reconstructed outside the kernel, off the kernel's critical path.
        min_encodings = jax.nn.one_hot(min_idx[:, 0], n_e, dtype=z.dtype)

    # TODO(synk): forward only -- the straight-through estimator and the two-term
    # (sg[...]) loss gradients need a custom_vjp around this pallas_call.
    # TODO(synk): codebooks with n_e in the many-thousands need an extra n_e-tile
    # grid axis (flash-style running argmin) to bound VMEM on v7x (64 MiB/TC).
    return z_q, loss, (perplexity, min_encodings, min_idx)


def _check(z, embedding, beta, z_q, loss, perp, min_enc, min_idx, tie_tol=1e-4):
    """Verify against the PyTorch-module math (argmin compared up to numerical ties)."""
    B, C, H, W = z.shape
    n_e, e_dim = embedding.shape
    n = B * H * W
    zf = jnp.transpose(z, (0, 2, 3, 1)).reshape(-1, e_dim).astype(jnp.float32)
    emb = embedding.astype(jnp.float32)
    d = (jnp.sum(zf ** 2, axis=1, keepdims=True) + jnp.sum(emb ** 2, axis=1)
         - 2.0 * zf @ emb.T)
    idx_ref = jnp.argmin(d, axis=1).astype(jnp.int32)

    assert min_idx.shape == (n, 1) and min_idx.dtype == jnp.int32
    ki = min_idx[:, 0]
    assert bool(jnp.all((ki >= 0) & (ki < n_e))), "index out of range"
    rows = jnp.arange(n)
    gap = jnp.abs(d[rows, ki] - d[rows, idx_ref])
    assert bool(jnp.all((ki == idx_ref) | (gap <= tie_tol))), \
        "argmin mismatch beyond tie tolerance"

    assert z_q.shape == z.shape and z_q.dtype == z.dtype
    zq_rows = jnp.transpose(z_q, (0, 2, 3, 1)).reshape(-1, e_dim)
    assert jnp.allclose(zq_rows, emb[ki], atol=1e-5, rtol=1e-5), \
        "z_q != selected codebook rows"

    loss_ref = (1.0 + beta) * jnp.mean((emb[ki] - zf) ** 2)
    assert jnp.allclose(loss, loss_ref, atol=1e-6, rtol=1e-4), "loss mismatch"

    e_mean = jnp.bincount(ki, length=n_e).astype(jnp.float32) / n
    perp_ref = jnp.exp(-jnp.sum(e_mean * jnp.log(e_mean + 1e-10)))
    assert jnp.allclose(perp, perp_ref, atol=1e-4, rtol=1e-4), "perplexity mismatch"

    if min_enc is not None:
        assert jnp.array_equal(min_enc, jax.nn.one_hot(ki, n_e, dtype=z.dtype))


if __name__ == "__main__":
    n_e, e_dim, beta = 128, 16, 0.25
    key = jax.random.PRNGKey(0)
    k_emb, k_z1, k_z2, k_z3 = jax.random.split(key, 4)
    embedding = jax.random.uniform(
        k_emb, (n_e, e_dim), dtype=jnp.float32,
        minval=-1.0 / n_e, maxval=1.0 / n_e)            # matches nn.Embedding init

    # Case 1: ragged spatial axis (H*W = 144 -> 128-tile + masked tail), grid (2, 2).
    z1 = jax.random.normal(k_z1, (2, e_dim, 12, 12), dtype=jnp.float32)
    z_q, loss, (perp, enc, idx) = vector_quantizer_forward(z1, embedding, beta)
    jax.block_until_ready((z_q, loss, perp, enc, idx))
    _check(z1, embedding, beta, z_q, loss, perp, enc, idx)

    # Case 2: spatial axis an exact multiple of 128 (H*W = 256), grid (2, 1).
    z2 = jax.random.normal(k_z2, (2, e_dim, 16, 16), dtype=jnp.float32)
    z_q, loss, (perp, enc, idx) = vector_quantizer_forward(z2, embedding, beta)
    jax.block_until_ready((z_q, loss, perp, enc, idx))
    _check(z2, embedding, beta, z_q, loss, perp, enc, idx)

    # Case 3: spatial axis narrower than one lane tile (H*W = 64), full-dim block.
    z3 = jax.random.normal(k_z3, (2, e_dim, 8, 8), dtype=jnp.float32)
    z_q, loss, (perp, enc, idx) = vector_quantizer_forward(z3, embedding, beta)
    jax.block_until_ready((z_q, loss, perp, enc, idx))
    _check(z3, embedding, beta, z_q, loss, perp, enc, idx)

    # Optional bf16-distance fast path (argmin may differ only at numerical
    # near-ties; all derived quantities stay self-consistent).
    z_q, loss, (perp, enc, idx) = vector_quantizer_forward(
        z1, embedding, beta, distance_in_bf16=True)
    jax.block_until_ready((z_q, loss, perp, enc, idx))
    _check(z1, embedding, beta, z_q, loss, perp, enc, idx, tie_tol=2e-2)

    print("KERNEL_OK")
</pallas_src>

<mosaic_0001>
module attributes {stable_mosaic.version = 11 : i64} {
  func.func @_vq_kernel(%arg0: i32, %arg1: i32, %arg2: memref<1x16x128xf32, #tpu.memory_space<vmem>>, %arg3: memref<128x16xf32, #tpu.memory_space<vmem>>, %arg4: memref<128x1xf32, #tpu.memory_space<vmem>>, %arg5: memref<1x16x128xf32, #tpu.memory_space<vmem>>, %arg6: memref<1x1x128xi32, #tpu.memory_space<vmem>>, %arg7: memref<1x1x1x1xf32, #tpu.memory_space<vmem>>, %arg8: memref<1x1x128x1xf32, #tpu.memory_space<vmem>>) attributes {dimension_semantics = [#tpu.dimension_semantics<parallel>, #tpu.dimension_semantics<parallel>], iteration_bounds = array<i64: 2, 2>, scalar_prefetch = 0 : i64, scratch_operands = 0 : i64, tpu.core_type = #tpu.core_type<tc>, window_params = [{transform_indices = @transform_0, window_bounds = array<i64: 1, 16, 128>}, {pipeline_mode = #tpu.pipeline_mode<synchronous>, transform_indices = @transform_1, window_bounds = array<i64: 128, 16>}, {pipeline_mode = #tpu.pipeline_mode<synchronous>, transform_indices = @transform_2, window_bounds = array<i64: 128, 1>}, {transform_indices = @transform_3, window_bounds = array<i64: 1, 16, 128>}, {transform_indices = @transform_4, window_bounds = array<i64: 1, 1, 128>}, {transform_indices = @transform_5, window_bounds = array<i64: 1, 1, 1, 1>}, {transform_indices = @transform_6, window_bounds = array<i64: 1, 1, 128, 1>}]} {
    %c0 = arith.constant 0 : index
    %c0_0 = arith.constant 0 : index
    %c0_1 = arith.constant 0 : index
    %0 = vector.load %arg2[%c0, %c0_0, %c0_1] : memref<1x16x128xf32, #tpu.memory_space<vmem>>, vector<1x16x128xf32>
    %1 = vector.shape_cast %0 : vector<1x16x128xf32> to vector<16x128xf32>
    %c0_2 = arith.constant 0 : index
    %c0_3 = arith.constant 0 : index
    %2 = vector.load %arg3[%c0_2, %c0_3] : memref<128x16xf32, #tpu.memory_space<vmem>>, vector<128x16xf32>
    %cst = arith.constant dense<0.000000e+00> : vector<128x128xf32>
    %3 = tpu.matmul %2, %1, %cst {dimension_numbers = #tpu.dot_dimension_numbers<[1], [0], [0], [1], [0, 0, 1, 1], [], []>} : vector<128x16xf32>, vector<16x128xf32>, vector<128x128xf32> -> vector<128x128xf32>
    %4 = arith.mulf %1, %1 : vector<16x128xf32>
    %cst_4 = arith.constant dense<0.000000e+00> : vector<128xf32>
    %5 = vector.multi_reduction <add>, %4, %cst_4 [0] : vector<16x128xf32> to vector<128xf32>
    %6 = vector.shape_cast %5 : vector<128xf32> to vector<1x128xf32>
    %c0_5 = arith.constant 0 : index
    %c0_6 = arith.constant 0 : index
    %7 = vector.load %arg4[%c0_5, %c0_6] : memref<128x1xf32, #tpu.memory_space<vmem>>, vector<128x1xf32>
    %8 = vector.broadcast %7 : vector<128x1xf32> to vector<128x128xf32>
    %9 = vector.broadcast %6 : vector<1x128xf32> to vector<128x128xf32>
    %10 = arith.addf %8, %9 : vector<128x128xf32>
    %cst_7 = arith.constant 2.000000e+00 : f32
    %11 = vector.broadcast %cst_7 : f32 to vector<128x128xf32>
    %12 = arith.mulf %11, %3 : vector<128x128xf32>
    %13 = arith.subf %10, %12 : vector<128x128xf32>
    %cst_8 = arith.constant dense<0x7F800000> : vector<128xf32>
    %14 = vector.multi_reduction <minimumf>, %13, %cst_8 [0] : vector<128x128xf32> to vector<128xf32>
    %15 = vector.shape_cast %14 : vector<128xf32> to vector<1x128xf32>
    %16 = tpu.iota {dimensions = array<i32: 0>} : vector<128x128xi32>
    %17 = vector.broadcast %15 : vector<1x128xf32> to vector<128x128xf32>
    %18 = arith.cmpf oeq, %13, %17 : vector<128x128xf32>
    %c128_i32 = arith.constant 128 : i32
    %19 = vector.broadcast %c128_i32 : i32 to vector<128x128xi32>
    %20 = arith.select %18, %16, %19 : vector<128x128xi1>, vector<128x128xi32>
    %cst_9 = arith.constant dense<2147483647> : vector<128xi32>
    %21 = vector.multi_reduction <minsi>, %20, %cst_9 [0] : vector<128x128xi32> to vector<128xi32>
    %22 = vector.shape_cast %21 : vector<128xi32> to vector<1x128xi32>
    %23 = vector.broadcast %22 : vector<1x128xi32> to vector<128x128xi32>
    %24 = arith.cmpi eq, %16, %23 : vector<128x128xi32>
    %c0_10 = arith.constant 0 : index
    %c0_11 = arith.constant 0 : index
    %c0_12 = arith.constant 0 : index
    %25 = vector.load %arg6[%c0_10, %c0_11, %c0_12] : memref<1x1x128xi32, #tpu.memory_space<vmem>>, vector<1x1x128xi32>
    %26 = vector.shape_cast %25 : vector<1x1x128xi32> to vector<1x128xi32>
    %27 = vector.shape_cast %22 : vector<1x128xi32> to vector<1x1x128xi32>
    tpu.vector_store %arg6[%c0_10, %c0_11, %c0_12], %27 {strides = array<i32>} : memref<1x1x128xi32, #tpu.memory_space<vmem>>, vector<1x1x128xi32>,
    %28 = arith.extui %24 : vector<128x128xi1> to vector<128x128xi32>
    %29 = arith.sitofp %28 : vector<128x128xi32> to vector<128x128xf32>
    %cst_13 = arith.constant dense<0.000000e+00> : vector<16x128xf32>
    %30 = tpu.matmul %2, %29, %cst_13 {dimension_numbers = #tpu.dot_dimension_numbers<[0], [0], [1], [1], [0, 1, 1, 1], [], []>} : vector<128x16xf32>, vector<128x128xf32>, vector<16x128xf32> -> vector<16x128xf32>
    %c0_14 = arith.constant 0 : index
    %c0_15 = arith.constant 0 : index
    %c0_16 = arith.constant 0 : index
    %31 = vector.load %arg5[%c0_14, %c0_15, %c0_16] : memref<1x16x128xf32, #tpu.memory_space<vmem>>, vector<1x16x128xf32>
    %32 = vector.shape_cast %31 : vector<1x16x128xf32> to vector<16x128xf32>
    %33 = vector.shape_cast %30 : vector<16x128xf32> to vector<1x16x128xf32>
    tpu.vector_store %arg5[%c0_14, %c0_15, %c0_16], %33 {strides = array<i32>} : memref<1x16x128xf32, #tpu.memory_space<vmem>>, vector<1x16x128xf32>,
    %34 = arith.subf %30, %1 : vector<16x128xf32>
    %35 = arith.extui %24 : vector<128x128xi1> to vector<128x128xi32>
    %36 = arith.sitofp %35 : vector<128x128xi32> to vector<128x128xf32>
    %c1_i32 = arith.constant 1 : i32
    %37 = arith.cmpi eq, %arg1, %c1_i32 : i32
    %38 = arith.extui %37 : i1 to i32
    %c0_i32 = arith.constant 0 : i32
    %39 = arith.cmpi ne, %38, %c0_i32 : i32
    scf.if %39 {
      %c128_i32_19 = arith.constant 128 : i32
      %43 = arith.muli %arg1, %c128_i32_19 : i32
      %44 = tpu.iota {dimensions = array<i32: 1>} : vector<1x128xi32>
      %45 = vector.broadcast %43 : i32 to vector<1x128xi32>
      %46 = arith.addi %45, %44 : vector<1x128xi32>
      %c144_i32 = arith.constant 144 : i32
      %47 = vector.broadcast %c144_i32 : i32 to vector<1x128xi32>
      %48 = arith.cmpi slt, %46, %47 : vector<1x128xi32>
      %cst_20 = arith.constant 0.000000e+00 : f32
      %49 = vector.shape_cast %48 : vector<1x128xi1> to vector<1x128xi1>
      %50 = vector.broadcast %49 : vector<1x128xi1> to vector<16x128xi1>
      %51 = vector.broadcast %cst_20 : f32 to vector<16x128xf32>
      %52 = arith.select %50, %34, %51 : vector<16x128xi1>, vector<16x128xf32>
      %cst_21 = arith.constant 0.000000e+00 : f32
      %53 = vector.shape_cast %48 : vector<1x128xi1> to vector<1x128xi1>
      %54 = vector.broadcast %53 : vector<1x128xi1> to vector<128x128xi1>
      %55 = vector.broadcast %cst_21 : f32 to vector<128x128xf32>
      %56 = arith.select %54, %36, %55 : vector<128x128xi1>, vector<128x128xf32>
      %57 = arith.mulf %52, %52 : vector<16x128xf32>
      %58 = vector.shape_cast %57 : vector<16x128xf32> to vector<1x16x128xf32>
      %cst_22 = arith.constant dense<0.000000e+00> : vector<1xf32>
      %59 = vector.multi_reduction <add>, %58, %cst_22 [1, 2] : vector<1x16x128xf32> to vector<1xf32>
      %60 = vector.shape_cast %59 : vector<1xf32> to vector<1x1x1xf32>
      %61 = vector.extract %60[0, 0, 0] : f32 from vector<1x1x1xf32>
      %62 = vector.broadcast %61 : f32 to vector<1x1xf32>
      %c0_23 = arith.constant 0 : index
      %c0_24 = arith.constant 0 : index
      %c0_25 = arith.constant 0 : index
      %c0_26 = arith.constant 0 : index
      %63 = vector.load %arg7[%c0_23, %c0_24, %c0_25, %c0_26] : memref<1x1x1x1xf32, #tpu.memory_space<vmem>>, vector<1x1x1x1xf32>
      %64 = vector.shape_cast %63 : vector<1x1x1x1xf32> to vector<1x1xf32>
      %65 = vector.shape_cast %62 : vector<1x1xf32> to vector<1x1x1x1xf32>
      tpu.vector_store %arg7[%c0_23, %c0_24, %c0_25, %c0_26], %65 {strides = array<i32>} : memref<1x1x1x1xf32, #tpu.memory_space<vmem>>, vector<1x1x1x1xf32>,
      %cst_27 = arith.constant dense<0.000000e+00> : vector<128xf32>
      %66 = vector.multi_reduction <add>, %56, %cst_27 [1] : vector<128x128xf32> to vector<128xf32>
      %67 = vector.shape_cast %66 : vector<128xf32> to vector<128x1xf32>
      %c0_28 = arith.constant 0 : index
      %c0_29 = arith.constant 0 : index
      %c0_30 = arith.constant 0 : index
      %c0_31 = arith.constant 0 : index
      %68 = vector.load %arg8[%c0_28, %c0_29, %c0_30, %c0_31] : memref<1x1x128x1xf32, #tpu.memory_space<vmem>>, vector<1x1x128x1xf32>
      %69 = vector.shape_cast %68 : vector<1x1x128x1xf32> to vector<128x1xf32>
      %70 = vector.shape_cast %67 : vector<128x1xf32> to vector<1x1x128x1xf32>
      tpu.vector_store %arg8[%c0_28, %c0_29, %c0_30, %c0_31], %70 {strides = array<i32>} : memref<1x1x128x1xf32, #tpu.memory_space<vmem>>, vector<1x1x128x1xf32>,
    } else {
    }
    %c1_i32_17 = arith.constant 1 : i32
    %40 = arith.cmpi ne, %arg1, %c1_i32_17 : i32
    %41 = arith.extui %40 : i1 to i32
    %c0_i32_18 = arith.constant 0 : i32
    %42 = arith.cmpi ne, %41, %c0_i32_18 : i32
    scf.if %42 {
      %43 = arith.mulf %34, %34 : vector<16x128xf32>
      %44 = vector.shape_cast %43 : vector<16x128xf32> to vector<1x16x128xf32>
      %cst_19 = arith.constant dense<0.000000e+00> : vector<1xf32>
      %45 = vector.multi_reduction <add>, %44, %cst_19 [1, 2] : vector<1x16x128xf32> to vector<1xf32>
      %46 = vector.shape_cast %45 : vector<1xf32> to vector<1x1x1xf32>
      %47 = vector.extract %46[0, 0, 0] : f32 from vector<1x1x1xf32>
      %48 = vector.broadcast %47 : f32 to vector<1x1xf32>
      %c0_20 = arith.constant 0 : index
      %c0_21 = arith.constant 0 : index
      %c0_22 = arith.constant 0 : index
      %c0_23 = arith.constant 0 : index
      %49 = vector.load %arg7[%c0_20, %c0_21, %c0_22, %c0_23] : memref<1x1x1x1xf32, #tpu.memory_space<vmem>>, vector<1x1x1x1xf32>
      %50 = vector.shape_cast %49 : vector<1x1x1x1xf32> to vector<1x1xf32>
      %51 = vector.shape_cast %48 : vector<1x1xf32> to vector<1x1x1x1xf32>
      tpu.vector_store %arg7[%c0_20, %c0_21, %c0_22, %c0_23], %51 {strides = array<i32>} : memref<1x1x1x1xf32, #tpu.memory_space<vmem>>, vector<1x1x1x1xf32>,
      %cst_24 = arith.constant dense<0.000000e+00> : vector<128xf32>
      %52 = vector.multi_reduction <add>, %36, %cst_24 [1] : vector<128x128xf32> to vector<128xf32>
      %53 = vector.shape_cast %52 : vector<128xf32> to vector<128x1xf32>
      %c0_25 = arith.constant 0 : index
      %c0_26 = arith.constant 0 : index
      %c0_27 = arith.constant 0 : index
      %c0_28 = arith.constant 0 : index
      %54 = vector.load %arg8[%c0_25, %c0_26, %c0_27, %c0_28] : memref<1x1x128x1xf32, #tpu.memory_space<vmem>>, vector<1x1x128x1xf32>
      %55 = vector.shape_cast %54 : vector<1x1x128x1xf32> to vector<128x1xf32>
      %56 = vector.shape_cast %53 : vector<128x1xf32> to vector<1x1x128x1xf32>
      tpu.vector_store %arg8[%c0_25, %c0_26, %c0_27, %c0_28], %56 {strides = array<i32>} : memref<1x1x128x1xf32, #tpu.memory_space<vmem>>, vector<1x1x128x1xf32>,
    } else {
    }
    return
  }
  func.func @transform_0(%arg0: i32, %arg1: i32) -> (i32, i32, i32) {
    %c0_i32 = arith.constant 0 : i32
    %c0_i32_0 = arith.constant 0 : i32
    return %arg0, %c0_i32, %arg1 : i32, i32, i32
  }
  func.func @transform_1(%arg0: i32, %arg1: i32) -> (i32, i32) {
    %c0_i32 = arith.constant 0 : i32
    %c0_i32_0 = arith.constant 0 : i32
    %c0_i32_1 = arith.constant 0 : i32
    return %c0_i32, %c0_i32_0 : i32, i32
  }
  func.func @transform_2(%arg0: i32, %arg1: i32) -> (i32, i32) {
    %c0_i32 = arith.constant 0 : i32
    %c0_i32_0 = arith.constant 0 : i32
    %c0_i32_1 = arith.constant 0 : i32
    return %c0_i32, %c0_i32_0 : i32, i32
  }
  func.func @transform_3(%arg0: i32, %arg1: i32) -> (i32, i32, i32) {
    %c0_i32 = arith.constant 0 : i32
    %c0_i32_0 = arith.constant 0 : i32
    return %arg0, %c0_i32, %arg1 : i32, i32, i32
  }
  func.func @transform_4(%arg0: i32, %arg1: i32) -> (i32, i32, i32) {
    %c0_i32 = arith.constant 0 : i32
    %c0_i32_0 = arith.constant 0 : i32
    return %arg0, %c0_i32, %arg1 : i32, i32, i32
  }
  func.func @transform_5(%arg0: i32, %arg1: i32) -> (i32, i32, i32, i32) {
    %c0_i32 = arith.constant 0 : i32
    %c0_i32_0 = arith.constant 0 : i32
    %c0_i32_1 = arith.constant 0 : i32
    return %arg0, %arg1, %c0_i32, %c0_i32_0 : i32, i32, i32, i32
  }
  func.func @transform_6(%arg0: i32, %arg1: i32) -> (i32, i32, i32, i32) {
    %c0_i32 = arith.constant 0 : i32
    %c0_i32_0 = arith.constant 0 : i32
    %c0_i32_1 = arith.constant 0 : i32
    return %arg0, %arg1, %c0_i32, %c0_i32_0 : i32, i32, i32, i32
  }
}

</mosaic_0001>

<bundles_post_ra>
// kernel: tpu_custom_call.1
= control target key start
LH: loop header
LB: loop body
LE: loop exit
PB: predicated region body
PF: predicated region fallthrough
CT: control target
= control target key end

     0   :  { %s2298_s0 = inlined_call_operand.vmem [shape: f32[2,16,144], index: 0, kind: input, shape index: {}]   ;;  %s2299_s1 = inlined_call_operand.vmem [shape: f32[128,16], index: 1, kind: input, shape index: {}]   ;;  %s2300_s2 = inlined_call_operand.vmem [shape: f32[128,1], index: 2, kind: input, shape index: {}]   ;;  %s2301_s3 = inlined_call_operand.hbm [shape: f32[2,16,144], index: 3, kind: output, shape index: {0}]   ;;  %s2302_s4 = inlined_call_operand.hbm [shape: s32[2,1,144], index: 4, kind: output, shape index: {1}]   ;;  %s2303_s5 = inlined_call_operand.vmem [shape: f32[2,2,1,1], index: 5, kind: output, shape index: {2}]   ;;  %s2304_s6 = inlined_call_operand.vmem [shape: f32[2,2,128,1], index: 6, kind: output, shape index: {3}]  }
   0x1   :  { %2309 = sst [smem:[#allocation11_spill]] %s2298_s0 }
   0x2   :  { %2310 = sst [smem:[#allocation12_spill]] %s2299_s1 }
   0x3   :  { %2311 = sst [smem:[#allocation13_spill]] %s2300_s2 }
   0x4   :  { %2312 = sst [smem:[#allocation14_spill]] %s2301_s3 }
   0x5   :  { %2313 = sst [smem:[#allocation15_spill]] %s2303_s5 }
   0x6   :  { %12 = vsyncpa [#allocation4], 0 }
   0x7   :  { %14 = vsyncpa [#allocation4 + $0x1], 0 }
   0x8   :  { %15 = vsyncpa [#allocation6], 0 }
   0x9   :  { %17 = vsyncpa [#allocation6 + $0x1], 0  ;;  %s1602_s21 = smov 0   ;;  %s1604_s22 = smov 0  }
   0xa   :  { %s1606_s23 = smov 0   ;;  %s1608_s24 = smov 0  }
   0xb   :  { %s1610_s25 = smov 0   ;;  %s1612_s26 = smov 0  }
   0xc   :  { %s1614_s27 = smov 0   ;;  %s1616_s28 = smov 0  }
   0xd LB: > { %s1266_s29 = sadd.s32 4294967295, %s1559_s28   ;;  %s1267_s30 = sadd.s32 4294967294, %s1559_s28   ;;  %s1559_s28 = sphi %s1616_s28, %s23_s28   ;;  %s1555_s27 = sphi %s1614_s27, %s2334_s27   ;;  %s1551_s26 = sphi %s1612_s26, %s2333_s26   ;;  %s1547_s25 = sphi %s1610_s25, %s2332_s25   ;;  %s1543_s24 = sphi %s1608_s24, %s2331_s24   ;;  %s1539_s23 = sphi %s1606_s23, %s2330_s23   ;;  %s1535_s22 = sphi %s1604_s22, %s2329_s22   ;;  %s1531_s21 = sphi %s1602_s21, %s2328_s21  }
   0xe   : > { %s32_s7 = sadd.s32 1, %s1551_s26  ;;  %s35_s8 = sadd.s32 1, %s1555_s27 }
   0xf   : > { %p33_p0 = scmp.ge.s32.totalorder %s32_s7, 2  ;;  %p51_p1 = scmp.ne.s32.totalorder %s1539_s23, %s1535_s22 }
  0x10   : > { %p52_p2 = scmp.eq.s32.totalorder %s1559_s28, 0  ;;  %p125_p5 = scmp.eq.s32.totalorder %s1266_s29, 3 }
  0x11   : > { %s2336_s7 = smov (%p33_p0, %s32_s7), 0  ;;  %s2338_s8 = smov (!%p33_p0, %s35_s8), %s1555_s27 }
  0x12   : > { %2314 = sst [smem:[#allocation9_spill]] %s2336_s7  ;;  %s40_s9 = ssub.s32 %s1551_s26, %s2336_s7 }
  0x13   : > { %p1654_p3 = por %p52_p2, %p51_p1  ;;  %p37_p4 = scmp.ge.s32.totalorder %s2338_s8, 2 }
  0x14   : > { %p130_p6 = scmp.ne.s32.totalorder %s1535_s22, %s1531_s21  ;;  %p131_p7 = scmp.eq.s32.totalorder %s1267_s30, 3 }
  0x15   : > { %s2340_s8 = smov (%p37_p4, %s2338_s8), 0  ;;  %p1662_p8 = por %p125_p5, %p51_p1 }
  0x16   : > { %2316 = sst [smem:[#allocation10_spill]] %s2340_s8  ;;  %p1666_p9 = por %p131_p7, %p130_p6 }
  0x17   : > { %s39_s13 = ssub.s32 %s1555_s27, %s2340_s8  ;;  %s44_s15 = sadd.s32 1, %s1539_s23 }
  0x18   : > { %s41_s14 = sor.u32 %s40_s9, %s39_s13  ;;  %p1269_p11 = scmp.ge.s32.totalorder %s1559_s28, 4 }
  0x19   : > { %p42_p10 = scmp.eq.s32.totalorder %s41_s14, 0 }
  0x1a   : > { %237 = sbr.rel (%p1269_p11) target bundleno = 43 (0x2b), region = 24 }
  0x1b   : > { %s1674_s16 = scalar_select %p42_p10, %s1539_s23, %s44_s15  }
  0x1f   : > { %240 = sbr.rel (!%p1654_p3) target bundleno = 43 (0x2b), region = 28  ;;  %s242_s17 = sand.u32 (%p1654_p3), 1, %s1539_s23  }
  0x20   : > { %s1271_s18 = sshll.u32 (%p1654_p3), %s1555_s27, 2  ;;  %s1270_s19 = sshll.u32 (%p1654_p3), %s242_s17, 4 }
  0x21   : > { %s246_s20 = sadd.s32 (%p1654_p3), %s1551_s26, %s1271_s18  ;;  %s2319_s0 = sld [smem:[#allocation11_spill]] (%p1654_p3) }
  0x22   : > { %s1272_s29 = sshll.u32 (%p1654_p3), %s246_s20, 3  ;;  %s244_s14 = scalar_lea.vmem (%p1654_p3), [#allocation2], %s1270_s19 }
  0x27   : > { %s248_s13 = scalar_lea.vmem %s2319_s0, %s1272_s29 }
  0x28   : > { %v279_v0 = vld [vmem:[%s248_s13] sm:$0xff]  ;;  %v281_v1 = vld [vmem:[%s248_s13 + $0x10] sm:$0xff] }
  0x29   : > { %280 = vst [vmem:[%s244_s14] sm:$0xff] %v279_v0 }
  0x2a   : > { %282 = vst [vmem:[%s244_s14 + $0x8] sm:$0xff] %v281_v1 }
  0x2b PF: > { %p1273_p12 = scmp.ge.s32.totalorder %s1559_s28, 1  ;;  %p287_p13 = scmp.lt.s32.totalorder %s1559_s28, 5 }
  0x2d   : > { %p288_p0 = pnand %p1273_p12, %p287_p13 }
  0x2e   : > { %s2320_s2 = sld [smem:[#allocation13_spill]] (!%p288_p0)  ;;  %s1694_s19 = sand.u32 (!%p288_p0), 1, %s1535_s22  }
  0x2f   : > { %291 = sbr.rel (%p288_p0) target bundleno = 872 (0x368), region = 66  ;;  %p343_p1 = scmp.lt.s32.totalorder (!%p288_p0), %s1547_s25, 1 }
  0x30   : > { %s2305_s20 = sshll.u32 (!%p288_p0), %s1694_s19, 4  ;;  %p345_p2 = scmp.lt.s32.totalorder (!%p288_p0), %s1543_s24, 1 }
  0x31   : > { %s296_s30 = scalar_lea.vmem (!%p288_p0), [#allocation2], %s2305_s20  ;;  %s2321_s1 = sld [smem:[#allocation12_spill]] (!%p288_p0) }
  0x32   : > { %s2322_s5 = sld [smem:[#allocation15_spill]] (!%p288_p0)  ;;  %s2308_s20 = scalar_lea.vmem (!%p288_p0), [#allocation5], %s1694_s19 }
  0x33   : > { %p1328_p3 = scmp.ne.s32.totalorder (!%p288_p0), %s1543_s24, 1 }
  0x34   : > { %v502_v2 = vld [vmem:[%s2320_s2 + $0x10] sm:$0xff]  ;;  %v500_v3 = vld [vmem:[%s2320_s2] sm:$0xff]  ;;  %v1561_v4 = vmov 0   ;;  %s344_s29 = scalar_select %p343_p1, %s1547_s25, 1  ;;  %v1702_v5 = vld [vmem:[%s296_s30 + $0x8] sm:$0xff]  ;;  %vm377_vm0 = vcmask 130048  }
  0x35   : > { %1431 = vset.pattern.permute.xlu1 %v1561_v4  ;;  %1430 = vset.pattern.permute.xlu0 %v1561_v4  ;;  %v1704_v6 = vld [vmem:[%s296_s30] sm:$0xff]  ;;  %s346_s9 = scalar_select %p345_p2, %s1543_s24, 1  ;;  %v503_v11 = vld [vmem:[%s2320_s2 + $0x18] sm:$0xff]  ;;  %v501_v12 = vld [vmem:[%s2320_s2 + $0x8] sm:$0xff]  ;;  %v492_v42 = vmul.f32 %v1702_v5, %v1702_v5 }
  0x36   : > { %528 = vperm.xlu1 %1431, %v502_v2   ;;  %518 = vperm.xlu0 %1430, %v500_v3   ;;  %s1276_s10 = sshll.u32 %s344_s29, 1  ;;  %s1278_s15 = sshll.u32 %s344_s29, 5  ;;  %v504_v10 = vld [vmem:[%s2320_s2 + $0x20] sm:$0xff]  ;;  %v505_v16 = vld [vmem:[%s2320_s2 + $0x28] sm:$0xff]  ;;  %v507_v17 = vld [vmem:[%s2320_s2 + $0x38] sm:$0xff]  ;;  %v491_v43 = vmul.f32 %v1704_v6, %v1704_v6 }
  0x37   : > { %1432 = vset.pattern.permute.xlu2 %v1561_v4  ;;  %440 = vmatpush.msra.mxu0 %v1702_v5  ;;  %v1712_v7 = vld [vmem:[%s2321_s1] sm:$0xff]  ;;  %v1718_v8 = vld [vmem:[%s2321_s1 + $0x30] sm:$0xff]  ;;  %s348_s0 = sadd.s32 %s1276_s10, %s346_s9  ;;  %s1277_s8 = sshll.u32 %s346_s9, 4  ;;  %v362_v13 = vld [vmem:[%s2321_s1 + $0x8] sm:$0xff] }
  0x38   : > { %1337 = vmatpush.msra.mxu2 %v1702_v5  ;;  %1338 = vmatpush.msra.mxu3 %v1702_v5  ;;  %v1723_v9 = vld [vmem:[%s2321_s1 + $0x60] sm:$0xff]  ;;  %s1733_s17 = scalar_lea.vmem %s2322_s5, %s348_s0  ;;  %s356_s18 = sadd.s32 %s1278_s15, %s1277_s8  ;;  %v1759_v14 = vld [vmem:[%s2321_s1 + $0x38] sm:$0xff]  ;;  %v1764_v15 = vld [vmem:[%s2321_s1 + $0x68] sm:$0xff]  ;;  %v493_v46 = vadd.f32 %v492_v42, %v491_v43 }
  0x39   : > { %441 = vmatpush.msra.mxu0 %v1704_v6  ;;  %s1279_s13 = sshll.u32 %s356_s18, 3  ;;  %538 = vperm.xlu2 %1432, %v504_v10   ;;  %v506_v18 = vld [vmem:[%s2320_s2 + $0x30] sm:$0xff]  ;;  %v369_v20 = vld [vmem:[%s2321_s1 + $0x40] sm:$0xff]  ;;  %v509_v24 = vld [vmem:[%s2320_s2 + $0x48] sm:$0xff]  ;;  %s2323_s9 = sshll.u32 %s1694_s19, 4 }
  0x3a   : > { %1339 = vmatpush.msra.mxu2 %v1704_v6  ;;  %1340 = vmatpush.msra.mxu3 %v1704_v6  ;;  %s1751_s8 = scalar_lea.vmem %s2304_s6, %s1279_s13  ;;  %v363_v19 = vld [vmem:[%s2321_s1 + $0x10] sm:$0xff]  ;;  %v508_v22 = vld [vmem:[%s2320_s2 + $0x40] sm:$0xff]  ;;  %v364_v25 = vld [vmem:[%s2321_s1 + $0x18] sm:$0xff]  ;;  %v494_v48 = vrot.slane %v493_v46, 4  ;;  %s2102_s10 = scalar_lea.vmem [#allocation3], %s2323_s9 }
  0x3b   : > { %1280 = vmatmul.msk.f32.vlgmr.msra.gmra.mxu0 %vm377_vm0, %v1712_v7  ;;  %1286 = vmatmul.msk.f32.vlgmr.msra.gmra.mxu2 %vm377_vm0, %v1718_v8  ;;  %v1789_v21 = vld [vmem:[%s2321_s1 + $0x70] sm:$0xff]  ;;  %v370_v26 = vld [vmem:[%s2321_s1 + $0x48] sm:$0xff]  ;;  %v1813_v27 = vld [vmem:[%s2321_s1 + $0x78] sm:$0xff]  ;;  %s1329_s30 = sshll.u32 (!%p1328_p3), %s1543_s24, 7 }
  0x3c   : > { %1292 = vmatmul.msk.f32.vlgmr.msra.gmra.mxu3 %vm377_vm0, %v1723_v9  ;;  %v510_v23 = vld [vmem:[%s2320_s2 + $0x50] sm:$0xff]  ;;  %v511_v28 = vld [vmem:[%s2320_s2 + $0x58] sm:$0xff]  ;;  %v513_v29 = vld [vmem:[%s2320_s2 + $0x68] sm:$0xff]  ;;  %v495_v54 = vadd.f32 %v494_v48, %v493_v46 }
  0x3d   : > { %v512_v30 = vld [vmem:[%s2320_s2 + $0x60] sm:$0xff]  ;;  %v371_v32 = vld [vmem:[%s2321_s1 + $0x50] sm:$0xff]  ;;  %v515_v34 = vld [vmem:[%s2320_s2 + $0x78] sm:$0xff] }
  0x3e   : > { %533 = vperm.xlu1 %1431, %v503_v11   ;;  %523 = vperm.xlu0 %1430, %v501_v12   ;;  %v365_v31 = vld [vmem:[%s2321_s1 + $0x20] sm:$0xff]  ;;  %v514_v33 = vld [vmem:[%s2320_s2 + $0x70] sm:$0xff]  ;;  %v366_v35 = vld [vmem:[%s2321_s1 + $0x28] sm:$0xff]  ;;  %v496_v56 = vrot.slane %v495_v54, 2 }
  0x3f   : > { %v1848_v36 = vld [vmem:[%s2321_s1 + $0x58] sm:$0xff] }
  0x40   : > { %v497_v62 = vadd.f32 %v496_v56, %v495_v54 }
  0x41   : > { %543 = vperm.xlu2 %1432, %v505_v16  }
  0x42   : > { %v498_v63 = vrot.slane %v497_v62, 1 }
  0x43   : > { %1281 = vmatmul.msk.f32.gmra.mxu0 %vm377_vm0, %v362_v13  ;;  %1287 = vmatmul.msk.f32.gmra.mxu2 %vm377_vm0, %v1759_v14 }
  0x44   : > { %1293 = vmatmul.msk.f32.gmra.mxu3 %vm377_vm0, %v1764_v15  ;;  %v499_v3 = vadd.f32 %v498_v63, %v497_v62 }
  0x46   : > { %553 = vperm.xlu1 %1431, %v507_v17   ;;  %548 = vperm.xlu0 %1430, %v506_v18  }
  0x49   : > { %558 = vperm.xlu2 %1432, %v508_v22  }
  0x4b   : > { %1282 = vmatmul.msk.f32.gmra.mxu0 %vm377_vm0, %v363_v19  ;;  %1288 = vmatmul.msk.f32.gmra.mxu2 %vm377_vm0, %v369_v20 }
  0x4c   : > { %1294 = vmatmul.msk.f32.gmra.mxu3 %vm377_vm0, %v1789_v21 }
  0x4e   : > { %568 = vperm.xlu1 %1431, %v510_v23   ;;  %563 = vperm.xlu0 %1430, %v509_v24  }
  0x51   : > { %573 = vperm.xlu2 %1432, %v511_v28  }
  0x53   : > { %1283 = vmatmul.msk.f32.gmra.mxu0 %vm377_vm0, %v364_v25  ;;  %1289 = vmatmul.msk.f32.gmra.mxu2 %vm377_vm0, %v370_v26 }
  0x54   : > { %1295 = vmatmul.msk.f32.gmra.mxu3 %vm377_vm0, %v1813_v27 }
  0x56   : > { %583 = vperm.xlu1 %1431, %v513_v29   ;;  %578 = vperm.xlu0 %1430, %v512_v30  }
  0x59   : > { %588 = vperm.xlu2 %1432, %v514_v33  }
  0x5b   : > { %1284 = vmatmul.msk.f32.gmra.mxu0 %vm377_vm0, %v365_v31  ;;  %1290 = vmatmul.msk.f32.gmra.mxu2 %vm377_vm0, %v371_v32 }
  0x5e   : > { %593 = vperm.xlu0 %1430, %v515_v34  }
  0x63   : > { %1285 = vmatmul.msk.f32.gmra.mxu0 %vm377_vm0, %v366_v35  ;;  %1291 = vmatmul.msk.f32.gmra.mxu2 %vm377_vm0, %v1848_v36 }
  0x8b   : > { %802 = vxpose.xlu1.b32.start [1/16] (narrow) %v1712_v7, 16 }
  0x93   : > { %803 = vxpose.xlu1.b32.cont [2/16] (narrow) %v362_v13, 16  ;;  %v539_v40 = vpop.permute.xlu2 %538 }
  0x94   : > { %v600_v12 = vadd.f32 %v539_v40, %v499_v3 }
  0x9b   : > { %804 = vxpose.xlu1.b32.cont [3/16] (narrow) %v363_v19, 16  ;;  %v544_v51 = vpop.permute.xlu2 %543 }
  0x9c   : > { %v601_v13 = vadd.f32 %v544_v51, %v499_v3 }
  0xa3   : > { %805 = vxpose.xlu1.b32.cont [4/16] (narrow) %v364_v25, 16  ;;  %v559_v60 = vpop.permute.xlu2 %558 }
  0xa4   : > { %v604_v17 = vadd.f32 %v559_v60, %v499_v3 }
  0xa8   : > { %v519_v37 = vpop.permute.xlu0 %518  ;;  %v529_v39 = vpop.permute.xlu1 %528 }
  0xa9   : > { %v596_v10 = vadd.f32 %v519_v37, %v499_v3  ;;  %v598_v16 = vadd.f32 %v529_v39, %v499_v3 }
  0xab   : > { %806 = vxpose.xlu1.b32.cont [5/16] (narrow) %v365_v31, 16  ;;  %v574_v7 = vpop.permute.xlu2 %573 }
  0xac   : > { %v607_v18 = vadd.f32 %v574_v7, %v499_v3 }
  0xb0   : > { %v524_v41 = vpop.permute.xlu0 %523  ;;  %v534_v47 = vpop.permute.xlu1 %533 }
  0xb1   : > { %v599_v22 = vadd.f32 %v534_v47, %v499_v3  ;;  %v597_v23 = vadd.f32 %v524_v41, %v499_v3 }
  0xb3   : > { %807 = vxpose.xlu1.b32.cont [6/16] (narrow) %v366_v35, 16 }
  0xb8   : > { %v443_v38 = vpop.f32.mrf.mxu0  ;;  %v549_v52 = vpop.permute.xlu0 %548 }
  0xb9   : > { %v554_v55 = vpop.permute.xlu1 %553  ;;  %v612_v11 = vmul.f32 2.0, %v443_v38 }
  0xba   : > { %v603_v24 = vadd.f32 %v554_v55, %v499_v3 }
  0xbb   : > { %808 = vxpose.xlu1.b32.cont [7/16] (narrow) %v1718_v8, 16  ;;  %v1860_v28 = vsub.f32 %v596_v10, %v612_v11 }
  0xbe   : > { %v461_v44 = vpop.f32.mrf.mxu2 }
  0xbf   : > { %v479_v49 = vpop.f32.mrf.mxu3  ;;  %v618_v29 = vmul.f32 2.0, %v461_v44 }
  0xc0   : > { %v446_v45 = vpop.f32.mrf.mxu0  ;;  %v564_v61 = vpop.permute.xlu0 %563  ;;  %v624_v38 = vmul.f32 2.0, %v479_v49 }
  0xc1   : > { %v569_v1 = vpop.permute.xlu1 %568  ;;  %v613_v25 = vmul.f32 2.0, %v446_v45  ;;  %v605_v41 = vadd.f32 %v564_v61, %v499_v3  ;;  %v589_v49 = vpop.permute.xlu2 %588 }
  0xc2   : > { %v606_v39 = vadd.f32 %v569_v1, %v499_v3  ;;  %v610_v1 = vadd.f32 %v589_v49, %v499_v3 }
  0xc3   : > { %809 = vxpose.xlu1.b32.cont [8/16] (narrow) %v1759_v14, 16  ;;  %v1867_v43 = vsub.f32 %v597_v23, %v613_v25 }
  0xc6   : > { %v464_v50 = vpop.f32.mrf.mxu2 }
  0xc7   : > { %v482_v58 = vpop.f32.mrf.mxu3  ;;  %v619_v40 = vmul.f32 2.0, %v464_v50 }
  0xc8   : > { %v449_v53 = vpop.f32.mrf.mxu0  ;;  %v579_v8 = vpop.permute.xlu0 %578  ;;  %v625_v47 = vmul.f32 2.0, %v482_v58 }
  0xc9   : > { %v614_v19 = vmul.f32 2.0, %v449_v53  ;;  %v635_v56 = vsub.f32 %v603_v24, %v619_v40 }
  0xcb   : > { %810 = vxpose.xlu1.b32.cont [9/16] (narrow) %v369_v20, 16  ;;  %v1864_v42 = vsub.f32 %v598_v16, %v614_v19 }
  0xce   : > { %v467_v57 = vpop.f32.mrf.mxu2 }
  0xcf   : > { %v485_v4 = vpop.f32.mrf.mxu3  ;;  %v620_v45 = vmul.f32 2.0, %v467_v57  ;;  %v608_v57 = vadd.f32 %v579_v8, %v499_v3 }
  0xd0   : > { %v452_v59 = vpop.f32.mrf.mxu0  ;;  %v594_v53 = vpop.permute.xlu0 %593 }
  0xd1   : > { %v615_v30 = vmul.f32 2.0, %v452_v59  ;;  %v626_v59 = vmul.f32 2.0, %v485_v4  ;;  %v1885_v61 = vsub.f32 %v604_v17, %v620_v45  ;;  %v611_v7 = vadd.f32 %v594_v53, %v499_v3 }
  0xd3   : > { %811 = vxpose.xlu1.b32.cont [10/16] (narrow) %v370_v26, 16  ;;  %v602_v26 = vadd.f32 %v549_v52, %v499_v3  ;;  %v1873_v51 = vsub.f32 %v599_v22, %v615_v30  ;;  %v1896_v4 = vsub.f32 %v610_v1, %v626_v59 }
  0xd5   : > { %v1871_v46 = vsub.f32 %v602_v26, %v618_v29  ;;  %v647_v10 = vmin.f32 %v1873_v51, %v635_v56 }
  0xd6   : > { %v470_v0 = vpop.f32.mrf.mxu2 }
  0xd7   : > { %v621_v33 = vmul.f32 2.0, %v470_v0  ;;  %v488_v52 = vpop.f32.mrf.mxu3  ;;  %v646_v58 = vmin.f32 %v1864_v42, %v1871_v46 }
  0xd8   : > { %v455_v2 = vpop.f32.mrf.mxu0  ;;  %v627_v62 = vmul.f32 2.0, %v488_v52 }
  0xd9   : > { %v616_v14 = vmul.f32 2.0, %v455_v2  ;;  %v1875_v50 = vsub.f32 %v605_v41, %v621_v33 }
  0xdb   : > { %812 = vxpose.xlu1.b32.cont [11/16] (narrow) %v371_v32, 16  ;;  %v584_v32 = vpop.permute.xlu1 %583  ;;  %v1862_v34 = vsub.f32 %v600_v12, %v616_v14  ;;  %v1898_v14 = vsub.f32 %v611_v7, %v627_v62 }
  0xdc   : > { %v609_v48 = vadd.f32 %v584_v32, %v499_v3 }
  0xde   : > { %v473_v20 = vpop.f32.mrf.mxu2  ;;  %v1888_v2 = vsub.f32 %v609_v48, %v625_v47 }
  0xdf   : > { %v622_v35 = vmul.f32 2.0, %v473_v20 }
  0xe0   : > { %v458_v31 = vpop.f32.mrf.mxu0 }
  0xe1   : > { %v617_v37 = vmul.f32 2.0, %v458_v31  ;;  %v1879_v54 = vsub.f32 %v606_v39, %v622_v35 }
  0xe3   : > { %813 = vxpose.xlu1.b32.cont [12/16] (narrow) %v1848_v36, 16  ;;  %v1869_v44 = vsub.f32 %v601_v13, %v617_v37  ;;  %v644_v36 = vmin.f32 %v1860_v28, %v1862_v34  ;;  %v650_v8 = vmin.f32 %v646_v58, %v1879_v54  ;;  %v1893_v13 = vsub.f32 %v608_v57, %v624_v38 }
  0xe5   : > { %v645_v55 = vmin.f32 %v1867_v43, %v1869_v44  ;;  %v648_v11 = vmin.f32 %v644_v36, %v1885_v61  ;;  %v654_v19 = vmin.f32 %v650_v8, %v1896_v4 }
  0xe6   : > { %v476_v60 = vpop.f32.mrf.mxu2 }
  0xe7   : > { %v649_v63 = vmin.f32 %v645_v55, %v1875_v50  ;;  %v623_v0 = vmul.f32 2.0, %v476_v60  ;;  %v652_v3 = vmin.f32 %v648_v11, %v1893_v13 }
  0xe9   : > { %v639_v12 = vsub.f32 %v607_v18, %v623_v0  ;;  %v653_v16 = vmin.f32 %v649_v63, %v1888_v2 }
  0xeb   : > { %814 = vxpose.xlu1.b32.cont [13/16] (narrow) %v1723_v9, 16  ;;  %v651_v17 = vmin.f32 %v647_v10, %v639_v12  ;;  %v656_v22 = vmin.f32 %v652_v3, %v653_v16  ;;  %v665_v9 = vlaneseq }
  0xed   : > { %v655_v20 = vmin.f32 %v651_v17, %v1898_v14  ;;  %v1906_v29 = vshrl.u32 %v665_v9, 7 }
  0xef   : > { %v657_v23 = vmin.f32 %v654_v19, %v655_v20  ;;  %v1910_v32 = vadd.s32 24, %v1906_v29  ;;  %v1913_v33 = vadd.s32 56, %v1906_v29  ;;  %v1916_v35 = vadd.s32 88, %v1906_v29 }
  0xf0   : > { %v1922_v37 = vadd.s32 16, %v1906_v29  ;;  %v1925_v38 = vadd.s32 32, %v1906_v29  ;;  %v1931_v40 = vadd.s32 48, %v1906_v29  ;;  %v1934_v41 = vadd.s32 64, %v1906_v29 }
  0xf1   : > { %v658_v18 = vmin.f32 %v656_v22, %v657_v23  ;;  %v1937_v45 = vadd.s32 72, %v1906_v29  ;;  %v1940_v47 = vadd.s32 80, %v1906_v29  ;;  %v1943_v48 = vadd.s32 96, %v1906_v29 }
  0xf2   : > { %v1946_v52 = vadd.s32 104, %v1906_v29  ;;  %v1949_v49 = vadd.s32 112, %v1906_v29  ;;  %v1953_v53 = vadd.s32 120, %v1906_v29  ;;  %v1562_v23 = vmov 0.0  }
  0xf3   : > { %815 = vxpose.xlu1.b32.cont [14/16] (narrow) %v1764_v15, 16  ;;  %v659_v24 = vrot.slane %v658_v18, 4  ;;  %v1919_v15 = vadd.s32 8, %v1906_v29 }
  0xf5   : > { %v660_v25 = vmin.f32 %v658_v18, %v659_v24  ;;  %v1563_v24 = vmov 1.0  }
  0xf7   : > { %v661_v26 = vrot.slane %v660_v25, 2 }
  0xf9   : > { %v662_v30 = vmin.f32 %v660_v25, %v661_v26 }
  0xfb   : > { %816 = vxpose.xlu1.b32.cont [15/16] (narrow) %v1789_v21, 16  ;;  %v663_v31 = vrot.slane %v662_v30, 1  ;;  %v1928_v21 = vadd.s32 40, %v1906_v29 }
  0xfd   : > { %v664_v39 = vmin.f32 %v662_v30, %v663_v31 }
  0xff   : > { %vm685_vm1 = vcmp.eq.f32.partialorder %v1873_v51, %v664_v39  ;;  %vm689_vm2 = vcmp.eq.f32.partialorder %v635_v56, %v664_v39  ;;  %vm693_vm3 = vcmp.eq.f32.partialorder %v639_v12, %v664_v39  ;;  %vm682_vm4 = vcmp.eq.f32.partialorder %v1860_v28, %v664_v39 }
 0x100   : > { %v701_v36 = vsel %vm685_vm1, %v1910_v32, 128  ;;  %v705_v55 = vsel %vm689_vm2, %v1913_v33, 128  ;;  %v709_v57 = vsel %vm693_vm3, %v1916_v35, 128  ;;  %vm683_vm6 = vcmp.eq.f32.partialorder %v1867_v43, %v664_v39 }
 0x101   : > { %vm720_vm5 = vcmp.lt.s32.totalorder %v701_v36, %v705_v55  ;;  %vm684_vm7 = vcmp.eq.f32.partialorder %v1864_v42, %v664_v39  ;;  %vm686_vm8 = vcmp.eq.f32.partialorder %v1862_v34, %v664_v39  ;;  %vm687_vm9 = vcmp.eq.f32.partialorder %v1869_v44, %v664_v39 }
 0x102   : > { %v721_v51 = vsel %vm720_vm5, %v701_v36, %v705_v55  ;;  %vm688_vm10 = vcmp.eq.f32.partialorder %v1871_v46, %v664_v39  ;;  %vm690_vm11 = vcmp.eq.f32.partialorder %v1885_v61, %v664_v39  ;;  %vm691_vm13 = vcmp.eq.f32.partialorder %v1875_v50, %v664_v39 }
 0x103   : > { %817 = vxpose.xlu1.b32.end [16/16] (narrow) %v1813_v27, 16  ;;  %vm728_vm12 = vcmp.lt.s32.totalorder %v721_v51, %v709_v57  ;;  %vm692_vm14 = vcmp.eq.f32.partialorder %v1879_v54, %v664_v39  ;;  %vm694_vm15 = vcmp.eq.f32.partialorder %v1893_v13, %v664_v39  ;;  %vm695_vm0 = vcmp.eq.f32.partialorder %v1888_v2, %v664_v39 }
 0x104   : > { %vm697_vm1 = vcmp.eq.f32.partialorder %v1898_v14, %v664_v39  ;;  %v698_v27 = vsel %vm682_vm4, %v1906_v29, 128  ;;  %v699_v34 = vsel %vm683_vm6, %v1919_v15, 128  ;;  %v700_v42 = vsel %vm684_vm7, %v1922_v37, 128 }
 0x105   : > { %v702_v43 = vsel %vm686_vm8, %v1925_v38, 128  ;;  %v703_v44 = vsel %vm687_vm9, %v1928_v21, 128  ;;  %v704_v46 = vsel %vm688_vm10, %v1931_v40, 128  ;;  %vm696_vm2 = vcmp.eq.f32.partialorder %v1896_v4, %v664_v39 }
 0x106   : > { %v706_v50 = vsel %vm690_vm11, %v1934_v41, 128  ;;  %v707_v54 = vsel %vm691_vm13, %v1937_v45, 128  ;;  %v708_v56 = vsel %vm692_vm14, %v1940_v47, 128  ;;  %v710_v28 = vsel %vm694_vm15, %v1943_v48, 128 }
 0x107   : > { %v711_v58 = vsel %vm695_vm0, %v1946_v52, 128  ;;  %v713_v59 = vsel %vm697_vm1, %v1953_v53, 128  ;;  %vm714_vm3 = vcmp.lt.s32.totalorder %v698_v27, %v702_v43  ;;  %vm716_vm4 = vcmp.lt.s32.totalorder %v699_v34, %v703_v44 }
 0x108   : > { %v715_v60 = vsel %vm714_vm3, %v698_v27, %v702_v43  ;;  %vm718_vm5 = vcmp.lt.s32.totalorder %v700_v42, %v704_v46  ;;  %v729_v61 = vsel %vm728_vm12, %v721_v51, %v709_v57  ;;  %v717_v62 = vsel %vm716_vm4, %v699_v34, %v703_v44 }
 0x109   : > { %v719_v63 = vsel %vm718_vm5, %v700_v42, %v704_v46  ;;  %vm722_vm6 = vcmp.lt.s32.totalorder %v715_v60, %v706_v50  ;;  %vm736_vm7 = vcmp.lt.s32.totalorder %v729_v61, %v713_v59  ;;  %v712_v0 = vsel %vm696_vm2, %v1949_v49, 128 }
 0x10a   : > { %v723_v1 = vsel %vm722_vm6, %v715_v60, %v706_v50  ;;  %vm724_vm8 = vcmp.lt.s32.totalorder %v717_v62, %v707_v54  ;;  %vm726_vm9 = vcmp.lt.s32.totalorder %v719_v63, %v708_v56  ;;  %v737_v10 = vsel %vm736_vm7, %v729_v61, %v713_v59 }
 0x10b   : > { %v725_v2 = vsel %vm724_vm8, %v717_v62, %v707_v54  ;;  %v727_v7 = vsel %vm726_vm9, %v719_v63, %v708_v56  ;;  %vm730_vm10 = vcmp.lt.s32.totalorder %v723_v1, %v710_v28 }
 0x10c   : > { %v731_v11 = vsel %vm730_vm10, %v723_v1, %v710_v28  ;;  %vm732_vm11 = vcmp.lt.s32.totalorder %v725_v2, %v711_v58  ;;  %vm734_vm13 = vcmp.lt.s32.totalorder %v727_v7, %v712_v0 }
 0x10d   : > { %v733_v8 = vsel %vm732_vm11, %v725_v2, %v711_v58  ;;  %v735_v12 = vsel %vm734_vm13, %v727_v7, %v712_v0 }
 0x10e   : > { %vm738_vm12 = vcmp.lt.s32.totalorder %v731_v11, %v733_v8  ;;  %vm740_vm14 = vcmp.lt.s32.totalorder %v735_v12, %v737_v10 }
 0x10f   : > { %v739_v13 = vsel %vm738_vm12, %v731_v11, %v733_v8  ;;  %v741_v14 = vsel %vm740_vm14, %v735_v12, %v737_v10 }
 0x110   : > { %vm742_vm15 = vcmp.lt.s32.totalorder %v739_v13, %v741_v14 }
 0x111   : > { %v743_v4 = vsel %vm742_vm15, %v739_v13, %v741_v14 }
 0x112   : > { %v744_v16 = vrot.slane %v743_v4, 4 }
 0x114   : > { %vm745_vm0 = vcmp.lt.s32.totalorder %v743_v4, %v744_v16 }
 0x115   : > { %v746_v17 = vsel %vm745_vm0, %v743_v4, %v744_v16 }
 0x116   : > { %v747_v3 = vrot.slane %v746_v17, 2 }
 0x118   : > { %vm748_vm1 = vcmp.lt.s32.totalorder %v746_v17, %v747_v3 }
 0x119   : > { %v749_v19 = vsel %vm748_vm1, %v746_v17, %v747_v3 }
 0x11a   : > { %v750_v20 = vrot.slane %v749_v19, 1 }
 0x11c   : > { %vm751_vm2 = vcmp.lt.s32.totalorder %v749_v19, %v750_v20 }
 0x11d   : > { %v752_v22 = vsel %vm751_vm2, %v749_v19, %v750_v20 }
 0x11e   : > { %vm768_vm3 = vcmp.eq.s32.totalorder %v1953_v53, %v752_v22  ;;  %769 = vst [vmem:[%s2308_s20] sm:$0x1] %v752_v22  ;;  %vm767_vm4 = vcmp.eq.s32.totalorder %v1949_v49, %v752_v22  ;;  %vm766_vm5 = vcmp.eq.s32.totalorder %v1946_v52, %v752_v22  ;;  %vm765_vm6 = vcmp.eq.s32.totalorder %v1943_v48, %v752_v22 }
 0x11f   : > { %v1997_v18 = vsel %vm768_vm3, 1.0, %v1562_v23  ;;  %1312 = vmatpush.msk.msra.mxu1 %vm768_vm3, %v1563_v24  ;;  %v1999_v25 = vsel %vm767_vm4, 1.0, %v1562_v23  ;;  %v2003_v26 = vsel %vm766_vm5, 1.0, %v1562_v23  ;;  %v2007_v30 = vsel %vm765_vm6, 1.0, %v1562_v23 }
 0x120   : > { %vm764_vm7 = vcmp.eq.s32.totalorder %v1916_v35, %v752_v22  ;;  %vm763_vm8 = vcmp.eq.s32.totalorder %v1940_v47, %v752_v22  ;;  %vm762_vm9 = vcmp.eq.s32.totalorder %v1937_v45, %v752_v22  ;;  %vm761_vm10 = vcmp.eq.s32.totalorder %v1934_v41, %v752_v22 }
 0x121   : > { %1313 = vmatpush.msk.msra.mxu1 %vm767_vm4, %v1563_v24  ;;  %v2015_v31 = vsel %vm764_vm7, 1.0, %v1562_v23  ;;  %v2019_v39 = vsel %vm763_vm8, 1.0, %v1562_v23  ;;  %v2023_v49 = vsel %vm762_vm9, 1.0, %v1562_v23  ;;  %v2027_v53 = vsel %vm761_vm10, 1.0, %v1562_v23 }
 0x122   : > { %vm760_vm11 = vcmp.eq.s32.totalorder %v1913_v33, %v752_v22  ;;  %vm759_vm13 = vcmp.eq.s32.totalorder %v1931_v40, %v752_v22  ;;  %vm758_vm12 = vcmp.eq.s32.totalorder %v1928_v21, %v752_v22  ;;  %vm757_vm14 = vcmp.eq.s32.totalorder %v1925_v38, %v752_v22 }
 0x123   : > { %1314 = vmatpush.msk.msra.mxu1 %vm766_vm5, %v1563_v24  ;;  %v2037_v36 = vsel %vm760_vm11, 1.0, %v1562_v23  ;;  %v2041_v55 = vsel %vm759_vm13, 1.0, %v1562_v23  ;;  %v2045_v57 = vsel %vm758_vm12, 1.0, %v1562_v23  ;;  %v2049_v51 = vsel %vm757_vm14, 1.0, %v1562_v23 }
 0x124   : > { %vm756_vm15 = vcmp.eq.s32.totalorder %v1910_v32, %v752_v22  ;;  %vm755_vm0 = vcmp.eq.s32.totalorder %v1922_v37, %v752_v22  ;;  %vm754_vm1 = vcmp.eq.s32.totalorder %v1919_v15, %v752_v22  ;;  %vm753_vm2 = vcmp.eq.s32.totalorder %v1906_v29, %v752_v22 }
 0x125   : > { %1315 = vmatpush.msk.msra.mxu1 %vm765_vm6, %v1563_v24  ;;  %v2059_v52 = vsel %vm756_vm15, 1.0, %v1562_v23  ;;  %v2063_v27 = vsel %vm755_vm0, 1.0, %v1562_v23  ;;  %v2067_v34 = vsel %vm754_vm1, 1.0, %v1562_v23  ;;  %v2071_v42 = vsel %vm753_vm2, 1.0, %v1562_v23 }
 0x127   : > { %1316 = vmatpush.msk.msra.mxu1 %vm764_vm7, %v1563_v24 }
 0x129   : > { %1317 = vmatpush.msk.msra.mxu1 %vm763_vm8, %v1563_v24 }
 0x12b   : > { %1318 = vmatpush.msk.msra.mxu1 %vm762_vm9, %v1563_v24 }
 0x12d   : > { %1319 = vmatpush.msk.msra.mxu1 %vm761_vm10, %v1563_v24 }
 0x12f   : > { %1320 = vmatpush.msk.msra.mxu1 %vm760_vm11, %v1563_v24  ;;  %v818_v35 = vpop.trf.xlu1 }
 0x131   : > { %1321 = vmatpush.msk.msra.mxu1 %vm759_vm13, %v1563_v24 }
 0x133   : > { %1322 = vmatpush.msk.msra.mxu1 %vm758_vm12, %v1563_v24 }
 0x135   : > { %1323 = vmatpush.msk.msra.mxu1 %vm757_vm14, %v1563_v24 }
 0x137   : > { %1324 = vmatpush.msk.msra.mxu1 %vm756_vm15, %v1563_v24  ;;  %v819_v33 = vpop.trf.xlu1 }
 0x139   : > { %1325 = vmatpush.msk.msra.mxu1 %vm755_vm0, %v1563_v24 }
 0x13b   : > { %1326 = vmatpush.msk.msra.mxu1 %vm754_vm1, %v1563_v24 }
 0x13d   : > { %1327 = vmatpush.msk.msra.mxu1 %vm753_vm2, %v1563_v24 }
 0x13e   : > { %850 = vmatmul.f32.vlgmr.msra.gmra.mxu1 %v818_v35 }
 0x146   : > { %853 = vmatmul.f32.gmra.mxu1 %v819_v33 }
 0x1bb   : > { %v851_v21 = vpop.f32.mrf.mxu1 }
 0x1bc   : > { %v2098_v38 = vsub.f32 %v851_v21, %v1704_v6  ;;  %857 = vst [vmem:[%s2102_s10] sm:$0xff] %v851_v21 }
 0x1c0   : > { %864 = sbr.rel (%p1328_p3) target bundleno = 643 (0x283), region = 74 }
 0x1c3   : > { %v854_v32 = vpop.f32.mrf.mxu1 }
 0x1c4   : > { %858 = vst [vmem:[%s2102_s10 + $0x8] sm:$0xff] %v854_v32  ;;  %v2107_v15 = vsub.f32 %v854_v32, %v1702_v5 }
 0x1c5   : > { %v867_v29 = vand.u32 127, %v665_v9  ;;  %v868_v6 = vstv %s1329_s30  ;;  %vm938_vm4 = vcmask 7168   ;;  %vm904_vm5 = vcmask 0  }
 0x1c7   : > { %v869_v37 = vadd.s32 %v868_v6, %v867_v29 }
 0x1c9   : > { %vm870_vm3 = vcmp.lt.s32.totalorder %v869_v37, 144 }
 0x1ca   : > { %v873_v40 = vsel %vm870_vm3, %v2098_v38, 0.0  ;;  %v874_v41 = vsel %vm870_vm3, %v2107_v15, 0.0  ;;  %v876_v5 = vsel %vm870_vm3, %v2067_v34, 0.0  ;;  %v878_v45 = vsel %vm870_vm3, %v2059_v52, 0.0 }
 0x1cb   : > { %v891_v47 = vmul.f32 %v873_v40, %v873_v40  ;;  %v892_v48 = vmul.f32 %v874_v41, %v874_v41  ;;  %908 = vadd.xlane.f32.xlu1 %v876_v5  ;;  %912 = vadd.xlane.f32.xlu2 %v878_v45  ;;  %v877_v43 = vsel %vm870_vm3, %v2063_v27, 0.0  ;;  %v879_v44 = vsel %vm870_vm3, %v2049_v51, 0.0 }
 0x1cc   : > { %v875_v46 = vsel %vm870_vm3, %v2071_v42, 0.0  ;;  %v881_v50 = vsel %vm870_vm3, %v2041_v55, 0.0  ;;  %v882_v54 = vsel %vm870_vm3, %v2037_v36, 0.0  ;;  %v880_v56 = vsel %vm870_vm3, %v2045_v57, 0.0 }
 0x1cd   : > { %v893_v9 = vadd.f32 %v892_v48, %v891_v47  ;;  %v884_v28 = vsel %vm870_vm3, %v2023_v49, 0.0  ;;  %v885_v58 = vsel %vm870_vm3, %v2019_v39, 0.0  ;;  %v883_v59 = vsel %vm870_vm3, %v2027_v53, 0.0 }
 0x1ce   : > { %v887_v60 = vsel %vm870_vm3, %v2007_v30, 0.0  ;;  %v888_v61 = vsel %vm870_vm3, %v2003_v26, 0.0  ;;  %v886_v62 = vsel %vm870_vm3, %v2015_v31, 0.0  ;;  %v890_v63 = vsel %vm870_vm3, %v1997_v18, 0.0 }
 0x1cf   : > { %894 = vadd.xlane.f32.xlu0 %v893_v9  ;;  %v889_v0 = vsel %vm870_vm3, %v1999_v25, 0.0 }
 0x1d3   : > { %910 = vadd.xlane.f32.xlu1 %v877_v43  ;;  %914 = vadd.xlane.f32.xlu2 %v879_v44 }
 0x1d7   : > { %906 = vadd.xlane.f32.xlu0 %v875_v46 }
 0x1db   : > { %918 = vadd.xlane.f32.xlu1 %v881_v50  ;;  %920 = vadd.xlane.f32.xlu2 %v882_v54 }
 0x1df   : > { %916 = vadd.xlane.f32.xlu0 %v880_v56 }
 0x1e3   : > { %924 = vadd.xlane.f32.xlu1 %v884_v28  ;;  %926 = vadd.xlane.f32.xlu2 %v885_v58 }
 0x1e7   : > { %922 = vadd.xlane.f32.xlu0 %v883_v59 }
 0x1eb   : > { %930 = vadd.xlane.f32.xlu1 %v887_v60  ;;  %932 = vadd.xlane.f32.xlu2 %v888_v61 }
 0x1ef   : > { %928 = vadd.xlane.f32.xlu0 %v886_v62 }
 0x1f3   : > { %936 = vadd.xlane.f32.xlu1 %v890_v63 }
 0x1f7   : > { %934 = vadd.xlane.f32.xlu0 %v889_v0 }
 0x23e   : > { %v909_v1 = vpop.xlane.xlu1 %908  ;;  %v913_v2 = vpop.xlane.xlu2 %912 }
 0x23f   : > { %940 = vst.msk [vmem:[%s1751_s8 + $0x8] sm:$0xff] %vm938_vm4, %v909_v1 }
 0x240   : > { %942 = vst.msk [vmem:[%s1751_s8 + $0x18] sm:$0xff] %vm938_vm4, %v913_v2 }
 0x242   : > { %v895_v7 = vpop.xlane.xlu0 %894 }
 0x243   : > { %v896_v10 = vrot.slane %v895_v7, 4 }
 0x245   : > { %v897_v11 = vadd.f32 %v896_v10, %v895_v7 }
 0x246   : > { %v911_v8 = vpop.xlane.xlu1 %910  ;;  %v915_v12 = vpop.xlane.xlu2 %914 }
 0x247   : > { %v898_v13 = vrot.slane %v897_v11, 2  ;;  %941 = vst.msk [vmem:[%s1751_s8 + $0x10] sm:$0xff] %vm938_vm4, %v911_v8 }
 0x248   : > { %943 = vst.msk [vmem:[%s1751_s8 + $0x20] sm:$0xff] %vm938_vm4, %v915_v12 }
 0x249   : > { %v899_v14 = vadd.f32 %v898_v13, %v897_v11 }
 0x24a   : > { %v907_v4 = vpop.xlane.xlu0 %906 }
 0x24b   : > { %v900_v16 = vrot.slane %v899_v14, 1  ;;  %939 = vst.msk [vmem:[%s1751_s8] sm:$0xff] %vm938_vm4, %v907_v4 }
 0x24d   : > { %v901_v17 = vadd.f32 %v900_v16, %v899_v14 }
 0x24e   : > { %v919_v3 = vpop.xlane.xlu1 %918  ;;  %v921_v19 = vpop.xlane.xlu2 %920 }
 0x24f   : > { %1344 = vpush %v901_v17 }
 0x250   : > { %945 = vst.msk [vmem:[%s1751_s8 + $0x30] sm:$0xff] %vm938_vm4, %v919_v3 }
 0x251   : > { %946 = vst.msk [vmem:[%s1751_s8 + $0x38] sm:$0xff] %vm938_vm4, %v921_v19 }
 0x252   : > { %v917_v20 = vpop.xlane.xlu0 %916 }
 0x253   : > { %944 = vst.msk [vmem:[%s1751_s8 + $0x28] sm:$0xff] %vm938_vm4, %v917_v20 }
 0x256   : > { %v925_v22 = vpop.xlane.xlu1 %924  ;;  %v927_v23 = vpop.xlane.xlu2 %926 }
 0x257   : > { %948 = vst.msk [vmem:[%s1751_s8 + $0x48] sm:$0xff] %vm938_vm4, %v925_v22 }
 0x258   : > { %949 = vst.msk [vmem:[%s1751_s8 + $0x50] sm:$0xff] %vm938_vm4, %v927_v23 }
 0x25a   : > { %v923_v24 = vpop.xlane.xlu0 %922 }
 0x25b   : > { %947 = vst.msk [vmem:[%s1751_s8 + $0x40] sm:$0xff] %vm938_vm4, %v923_v24 }
 0x25e   : > { %v931_v35 = vpop.xlane.xlu1 %930  ;;  %v933_v33 = vpop.xlane.xlu2 %932 }
 0x25f   : > { %951 = vst.msk [vmem:[%s1751_s8 + $0x60] sm:$0xff] %vm938_vm4, %v931_v35 }
 0x260   : > { %952 = vst.msk [vmem:[%s1751_s8 + $0x68] sm:$0xff] %vm938_vm4, %v933_v33 }
 0x262   : > { %v929_v21 = vpop.xlane.xlu0 %928 }
 0x263   : > { %950 = vst.msk [vmem:[%s1751_s8 + $0x58] sm:$0xff] %vm938_vm4, %v929_v21 }
 0x266   : > { %v937_v32 = vpop.xlane.xlu1 %936 }
 0x267   : > { %954 = vst.msk [vmem:[%s1751_s8 + $0x78] sm:$0xff] %vm938_vm4, %v937_v32 }
 0x26a   : > { %v935_v29 = vpop.xlane.xlu0 %934 }
 0x26b   : > { %953 = vst.msk [vmem:[%s1751_s8 + $0x70] sm:$0xff] %vm938_vm4, %v935_v29 }
 0x280   : > { %s1345_s13 = spop %1344 }
 0x281   : > { %v903_v6 = vstv %s1345_s13 }
 0x282   : > { %905 = vst.msk [vmem:[%s1733_s17] sm:$0x1] %vm904_vm5, %v903_v6 }
 0x283 PF: > { %p1330_p4 = scmp.eq.s32.totalorder %s1543_s24, 1 }
 0x285   : > { %958 = sbr.rel (%p1330_p4) target bundleno = 834 (0x342), region = 78 }
 0x28a   : > { %v959_v37 = vmul.f32 %v2098_v38, %v2098_v38  ;;  %v960_v40 = vmul.f32 %v2107_v15, %v2107_v15  ;;  %976 = vadd.xlane.f32.xlu1 %v2067_v34  ;;  %980 = vadd.xlane.f32.xlu2 %v2059_v52  ;;  %vm1006_vm6 = vcmask 7168   ;;  %vm972_vm7 = vcmask 0  }
 0x28c   : > { %v961_v41 = vadd.f32 %v960_v40, %v959_v37 }
 0x28e   : > { %962 = vadd.xlane.f32.xlu0 %v961_v41 }
 0x292   : > { %978 = vadd.xlane.f32.xlu1 %v2063_v27  ;;  %982 = vadd.xlane.f32.xlu2 %v2049_v51 }
 0x296   : > { %974 = vadd.xlane.f32.xlu0 %v2071_v42 }
 0x29a   : > { %986 = vadd.xlane.f32.xlu1 %v2041_v55  ;;  %988 = vadd.xlane.f32.xlu2 %v2037_v36 }
 0x29e   : > { %984 = vadd.xlane.f32.xlu0 %v2045_v57 }
 0x2a2   : > { %992 = vadd.xlane.f32.xlu1 %v2023_v49  ;;  %994 = vadd.xlane.f32.xlu2 %v2019_v39 }
 0x2a6   : > { %990 = vadd.xlane.f32.xlu0 %v2027_v53 }
 0x2aa   : > { %998 = vadd.xlane.f32.xlu1 %v2007_v30  ;;  %1000 = vadd.xlane.f32.xlu2 %v2003_v26 }
 0x2ae   : > { %996 = vadd.xlane.f32.xlu0 %v2015_v31 }
 0x2b2   : > { %1004 = vadd.xlane.f32.xlu1 %v1997_v18 }
 0x2b6   : > { %1002 = vadd.xlane.f32.xlu0 %v1999_v25 }
 0x2fd   : > { %v977_v36 = vpop.xlane.xlu1 %976  ;;  %v981_v49 = vpop.xlane.xlu2 %980 }
 0x2fe   : > { %1008 = vst.msk [vmem:[%s1751_s8 + $0x8] sm:$0xff] %vm1006_vm6, %v977_v36 }
 0x2ff   : > { %1010 = vst.msk [vmem:[%s1751_s8 + $0x18] sm:$0xff] %vm1006_vm6, %v981_v49 }
 0x301   : > { %v963_v39 = vpop.xlane.xlu0 %962 }
 0x302   : > { %v964_v30 = vrot.slane %v963_v39, 4 }
 0x304   : > { %v965_v26 = vadd.f32 %v964_v30, %v963_v39 }
 0x305   : > { %v979_v53 = vpop.xlane.xlu1 %978  ;;  %v983_v31 = vpop.xlane.xlu2 %982 }
 0x306   : > { %v966_v55 = vrot.slane %v965_v26, 2  ;;  %1009 = vst.msk [vmem:[%s1751_s8 + $0x10] sm:$0xff] %vm1006_vm6, %v979_v53 }
 0x307   : > { %1011 = vst.msk [vmem:[%s1751_s8 + $0x20] sm:$0xff] %vm1006_vm6, %v983_v31 }
 0x308   : > { %v967_v18 = vadd.f32 %v966_v55, %v965_v26 }
 0x309   : > { %v975_v25 = vpop.xlane.xlu0 %974 }
 0x30a   : > { %v968_v57 = vrot.slane %v967_v18, 1  ;;  %1007 = vst.msk [vmem:[%s1751_s8] sm:$0xff] %vm1006_vm6, %v975_v25 }
 0x30c   : > { %v969_v51 = vadd.f32 %v968_v57, %v967_v18 }
 0x30d   : > { %v987_v52 = vpop.xlane.xlu1 %986  ;;  %v989_v27 = vpop.xlane.xlu2 %988 }
 0x30e   : > { %1346 = vpush %v969_v51 }
 0x30f   : > { %1013 = vst.msk [vmem:[%s1751_s8 + $0x30] sm:$0xff] %vm1006_vm6, %v987_v52 }
 0x310   : > { %1014 = vst.msk [vmem:[%s1751_s8 + $0x38] sm:$0xff] %vm1006_vm6, %v989_v27 }
 0x311   : > { %v985_v34 = vpop.xlane.xlu0 %984 }
 0x312   : > { %1012 = vst.msk [vmem:[%s1751_s8 + $0x28] sm:$0xff] %vm1006_vm6, %v985_v34 }
 0x315   : > { %v993_v42 = vpop.xlane.xlu1 %992  ;;  %v995_v38 = vpop.xlane.xlu2 %994 }
 0x316   : > { %1016 = vst.msk [vmem:[%s1751_s8 + $0x48] sm:$0xff] %vm1006_vm6, %v993_v42 }
 0x317   : > { %1017 = vst.msk [vmem:[%s1751_s8 + $0x50] sm:$0xff] %vm1006_vm6, %v995_v38 }
 0x319   : > { %v991_v15 = vpop.xlane.xlu0 %990 }
 0x31a   : > { %1015 = vst.msk [vmem:[%s1751_s8 + $0x40] sm:$0xff] %vm1006_vm6, %v991_v15 }
 0x31d   : > { %v999_v5 = vpop.xlane.xlu1 %998  ;;  %v1001_v45 = vpop.xlane.xlu2 %1000 }
 0x31e   : > { %1019 = vst.msk [vmem:[%s1751_s8 + $0x60] sm:$0xff] %vm1006_vm6, %v999_v5 }
 0x31f   : > { %1020 = vst.msk [vmem:[%s1751_s8 + $0x68] sm:$0xff] %vm1006_vm6, %v1001_v45 }
 0x321   : > { %v997_v47 = vpop.xlane.xlu0 %996 }
 0x322   : > { %1018 = vst.msk [vmem:[%s1751_s8 + $0x58] sm:$0xff] %vm1006_vm6, %v997_v47 }
 0x325   : > { %v1005_v48 = vpop.xlane.xlu1 %1004 }
 0x326   : > { %1022 = vst.msk [vmem:[%s1751_s8 + $0x78] sm:$0xff] %vm1006_vm6, %v1005_v48 }
 0x329   : > { %v1003_v9 = vpop.xlane.xlu0 %1002 }
 0x32a   : > { %1021 = vst.msk [vmem:[%s1751_s8 + $0x70] sm:$0xff] %vm1006_vm6, %v1003_v9 }
 0x33f   : > { %s1347_s0 = spop %1346 }
 0x340   : > { %v971_v43 = vstv %s1347_s0 }
 0x341   : > { %973 = vst.msk [vmem:[%s1733_s17] sm:$0x1] %vm972_vm7, %v971_v43 }
 0x342 PF: > { %s1332_s7 = sshll.u32 %s1547_s25, 2  ;;  %s1057_s29 = sshll.u32 %s2102_s10, 4  ;;  %s1058_s29 = int_to_ptr.vmem [resolvable:$true] %s1057_s29 }
 0x343   : > { %s1054_s15 = sadd.s32 %s1543_s24, %s1332_s7  ;;  %s2324_s3 = sld [smem:[#allocation14_spill]] }
 0x344   : > { %s1333_s14 = sshll.u32 %s1054_s15, 3  ;;  %s1024_s13 = scalar_lea.sflag [#allocation4], %s1694_s19 }
 0x349   : > { %s1056_s30 = scalar_lea.hbm %s2324_s3, %s1333_s14  ;;  %s1453_s10 = scalar_lea.hbm %s2324_s3, 64 }
 0x34a   : > { %s1059_s8 = sshll.u32 %s1056_s30, 4  ;;  %s1060_s8 = int_to_ptr.hbm [resolvable:$true] %s1059_s8 }
 0x34b   : > { %s1447_s0 = sshra.s32 %s1060_s8, 4  ;;  %s1448_s0 = int_to_ptr.hbm [resolvable:$true] %s1447_s0 }
 0x34c   : > { %s1449_s17 = scalar_lea.hbm %s1448_s0, 16  ;;  %p1454_p10 = scmp.lt.s32.totalorder %s1448_s0, %s2324_s3 }
 0x34d   : > { %p1450_p5 = scmp.ne.s32.totalorder %s1448_s0, %s1449_s17  ;;  %p1455_p11 = scmp.lt.s32.totalorder %s1453_s10, %s1449_s17 }
 0x34f   : > { %p1451_p6 = pnand %p1450_p5, %p1662_p8  ;;  %p1456_p12 = por %p1455_p11, %p1454_p10 }
 0x351   : > { %p1452_p7 = pneg %p1451_p6 }
 0x353   : > { %p1457_p13 = pnand %p1456_p12, %p1452_p7 }
 0x355   : > { %1460 = shalt.err (!%p1457_p13)
}
 0x356   : > { %s1564_s14 = smov 128   ;;  %s1565_s18 = smov 256  }
 0x357   : > { %s1566_s9 = smov 8   ;;  %s1334_s1 = sshll.u32 %s1547_s25, 1 }
 0x358   : > { %1348 = dma.vmem_to_hbm [thread:$0]  (%p1662_p8), %s1058_s29, 256, %s1060_s8, %s1024_s13, %s1564_s14, %s1565_s18, %s1566_s9  }
 0x359   : > { %s1072_s20 = sadd.s32 %s1543_s24, %s1334_s1  ;;  %s2325_s30 = scalar_lea.vmem [#allocation5], %s1694_s19 }
 0x35a   : > { %s1075_s7 = sshll.u32 %s2325_s30, 4  ;;  %s1073_s10 = scalar_lea.hbm %s2302_s4, %s1072_s20  ;;  %s1076_s7 = int_to_ptr.vmem [resolvable:$true] %s1075_s7 }
 0x35b   : > { %s1077_s15 = sshll.u32 %s1073_s10, 4  ;;  %s1029_s2 = scalar_lea.sflag [#allocation6], %s1694_s19  ;;  %s1078_s15 = int_to_ptr.hbm [resolvable:$true] %s1077_s15 }
 0x35c   : > { %s1475_s3 = sshra.s32 %s1078_s15, 4  ;;  %s1481_s24 = scalar_lea.hbm %s2302_s4, 4  ;;  %s1476_s3 = int_to_ptr.hbm [resolvable:$true] %s1475_s3 }
 0x35d   : > { %s1477_s5 = scalar_lea.hbm %s1476_s3, 1  ;;  %p1482_p3 = scmp.lt.s32.totalorder %s1476_s3, %s2302_s4 }
 0x35e   : > { %p1478_p0 = scmp.ne.s32.totalorder %s1476_s3, %s1477_s5  ;;  %p1483_p4 = scmp.lt.s32.totalorder %s1481_s24, %s1477_s5 }
 0x360   : > { %p1479_p1 = pnand %p1478_p0, %p1662_p8  ;;  %p1484_p5 = por %p1483_p4, %p1482_p3 }
 0x362   : > { %p1480_p2 = pneg %p1479_p1 }
 0x364   : > { %p1485_p6 = pnand %p1484_p5, %p1480_p2 }
 0x366   : > { %1488 = shalt.err (!%p1485_p6)
}
 0x367   : > { %1349 = dma.vmem_to_hbm [thread:$0]  (%p1662_p8), %s1076_s7, 16, %s1078_s15, %s1029_s2  }
 0x368 PF: > { %p1359_p7 = scmp.ge.s32.totalorder %s1559_s28, 2  ;;  %s1095_s19 = sand.u32 1, %s1531_s21  }
 0x369   : > { %s1096_s14 = scalar_lea.sflag [#allocation4], %s1095_s19 }
 0x36a   : > { %p1353_p10 = pnand %p1359_p7, %p1666_p9 }
 0x36c   : > { %p1354_p11 = pneg %p1353_p10 }
 0x36e   : > { %1522 = dma.done.wait (%p1354_p11), %s1096_s14, 256  }
 0x36f   : > { %1524 = vsyncadd (%p1354_p11), %s1096_s14, 4294967040  ;;  %s1106_s3 = scalar_lea.sflag [#allocation6], %s1095_s19 }
 0x370   : > { %1526 = dma.done.wait (%p1354_p11), %s1106_s3, 16  }
 0x371   : > { %1528 = vsyncadd (%p1354_p11), %s1106_s3, 4294967280  ;;  %s23_s28 = sadd.s32 1, %s1559_s28   ;;  %s2326_s2 = sld [smem:[#allocation9_spill]] }
 0x372   : > { %p20_p12 = scmp.ge.s32.totalorder %s23_s28, 6   ;;  %s2327_s5 = sld [smem:[#allocation10_spill]] }
 0x373   : > { %s2328_s21 = smov %s1535_s22  ;;  %s2329_s22 = smov %s1539_s23 }
 0x374   : > { %s2330_s23 = smov %s1674_s16  ;;  %s2331_s24 = smov %s1551_s26 }
 0x375   : > { %s2332_s25 = smov %s1555_s27  ;;  %22 = sbr.rel (!%p20_p12) target bundleno = 13 (0xd), region = 159 }
 0x377   : > { %s2333_s26 = smov %s2326_s2 }
 0x378   : > { %s2334_s27 = smov %s2327_s5 }
 0x37a   :  { %1133 = vsyncpa [#allocation4], 1 }
 0x37b   :  { %1135 = vsyncpa [#allocation4 + $0x1], 1 }
 0x37c   :  { %1136 = vsyncpa [#allocation6], 1 }
 0x37d   :  { %1138 = vsyncpa [#allocation6 + $0x1], 1 }

</bundles_post_ra>
